<compile_context>
chip_gen: v7x
topology: tpu7x:2x2x1
jax: 0.10.0
libtpu: 0.0.40
codegen_flags: <defaults>
</compile_context>

<pallas_src>
import functools
import math

import jax
import jax.numpy as jnp
from jax.experimental import pallas as pl
from jax.experimental.pallas import tpu as pltpu

# Bias value used for padded vocab columns: exp(logit - max) underflows to 0,
# so padded columns never contribute to the softmax normalizer.
_NEG_BIG = -1e30


def _round_up(x, m):
    return ((x + m - 1) // m) * m


def _vmem_capacity_bytes():
    try:
        info = pltpu.get_tpu_info()
        cap = getattr(info, "vmem_capacity_bytes", None)
        if cap:
            return int(cap)
    except Exception:
        pass
    return 64 * 1024 * 1024  # conservative default (v7x physical VMEM)


# ------------------------------- kernels ----------------------------------- #

def _fused_kernel(x_ref, w_ref, b_ref, o_ref):
    """Small-vocab path: weight resident, logits + log_softmax fused."""
    logits = jnp.dot(x_ref[...], w_ref[...],
                     preferred_element_type=jnp.float32)
    logits = logits + b_ref[...].astype(jnp.float32)
    m = jnp.max(logits, axis=-1, keepdims=True)
    lse = m + jnp.log(jnp.sum(jnp.exp(logits - m), axis=-1, keepdims=True))
    o_ref[...] = (logits - lse).astype(o_ref.dtype)


def _lse_kernel(x_ref, w_ref, b_ref, lse_ref, m_sc, l_sc):
    """Pass 1 of the vocab-tiled path: online logsumexp across vocab tiles."""
    j = pl.program_id(1)

    @pl.when(j == 0)
    def _():
        m_sc[...] = jnp.full_like(m_sc, -jnp.inf)
        l_sc[...] = jnp.zeros_like(l_sc)

    logits = jnp.dot(x_ref[...], w_ref[...],
                     preferred_element_type=jnp.float32)
    logits = logits + b_ref[...].astype(jnp.float32)

    m_prev = m_sc[...]
    m_new = jnp.maximum(m_prev, jnp.max(logits, axis=-1, keepdims=True))
    alpha = jnp.exp(m_prev - m_new)
    l_sc[...] = alpha * l_sc[...] + jnp.sum(jnp.exp(logits - m_new),
                                            axis=-1, keepdims=True)
    m_sc[...] = m_new

    @pl.when(j == pl.num_programs(1) - 1)
    def _():
        lse_ref[...] = m_sc[...] + jnp.log(l_sc[...])


def _output_kernel(x_ref, w_ref, b_ref, lse_ref, o_ref):
    """Pass 2 of the vocab-tiled path: recompute logits tile, subtract lse."""
    logits = jnp.dot(x_ref[...], w_ref[...],
                     preferred_element_type=jnp.float32)
    logits = logits + b_ref[...].astype(jnp.float32)
    o_ref[...] = (logits - lse_ref[...]).astype(o_ref.dtype)


# ------------------------------- wrapper ----------------------------------- #

def generator_forward(x, weight, bias, *, tm=256, tn=2048,
                      compute_dtype=jnp.bfloat16, out_dtype=None,
                      force_tiled=False):
    """log_softmax(x @ weight + bias, axis=-1).

    x:      [batch, seq, d_model]
    weight: [d_model, vocab]   (transpose of torch nn.Linear.weight)
    bias:   [vocab]
    Returns [batch, seq, vocab] log-probabilities in `out_dtype`
    (default: x.dtype), matching F.log_softmax(self.proj(x), dim=-1).
    """
    batch, seq, d_model = x.shape
    d_model_w, vocab = weight.shape
    assert d_model == d_model_w, "weight must be [d_model, vocab]"
    out_dtype = x.dtype if out_dtype is None else out_dtype
    compute_dtype = jnp.dtype(compute_dtype)

    n = batch * seq

    # --- row tiling (pad rows to a multiple of the row tile) ---
    n_pad = _round_up(n, 8)
    tm_eff = _round_up(min(tm, n_pad), 8)
    n_pad = _round_up(n_pad, tm_eff)

    # --- vocab tiling (pad vocab to a multiple of the vocab tile) ---
    v_pad = _round_up(vocab, 128)
    tn_eff = _round_up(min(tn, v_pad), 128)
    v_pad = _round_up(v_pad, tn_eff)

    # --- prepare operands (bf16 matmul inputs, f32 bias) ---
    x2d = x.reshape(n, d_model).astype(compute_dtype)
    w = weight.astype(compute_dtype)
    b2d = bias.astype(jnp.float32).reshape(1, vocab)

    if n_pad != n:
        x2d = jnp.pad(x2d, ((0, n_pad - n), (0, 0)))
    if v_pad != vocab:
        w = jnp.pad(w, ((0, 0), (0, v_pad - vocab)))
        b2d = jnp.pad(b2d, ((0, 0), (0, v_pad - vocab)),
                      constant_values=_NEG_BIG)

    row_tiles = n_pad // tm_eff
    vocab_tiles = v_pad // tn_eff

    cbytes = compute_dtype.itemsize
    obytes = jnp.dtype(out_dtype).itemsize

    vmem_cap = _vmem_capacity_bytes()
    vmem_limit = min(int(vmem_cap * 0.75), 96 * 1024 * 1024)
    compiler = functools.partial(pltpu.CompilerParams,
                                 vmem_limit_bytes=vmem_limit)

    # Estimated VMEM for the fused (weight-resident) path; every pipelined
    # input/output gets two buffers by default.
    fused_bytes = (
        2 * d_model * v_pad * cbytes        # weight (double buffered)
        + 2 * tm_eff * d_model * cbytes     # x tile
        + 2 * v_pad * 4                     # bias row
        + 2 * tm_eff * v_pad * obytes       # output tile
        + tm_eff * v_pad * 4                # f32 logits temporary
    )
    use_fused = (not force_tiled) and fused_bytes <= int(vmem_cap * 0.45)

    if use_fused:
        out = pl.pallas_call(
            _fused_kernel,
            out_shape=jax.ShapeDtypeStruct((n_pad, v_pad), out_dtype),
            grid_spec=pltpu.PrefetchScalarGridSpec(
                num_scalar_prefetch=0,
                grid=(row_tiles,),
                in_specs=[
                    pl.BlockSpec((tm_eff, d_model), lambda i: (i, 0)),
                    pl.BlockSpec((d_model, v_pad), lambda i: (0, 0)),
                    pl.BlockSpec((1, v_pad), lambda i: (0, 0)),
                ],
                out_specs=pl.BlockSpec((tm_eff, v_pad), lambda i: (i, 0)),
            ),
            compiler_params=compiler(dimension_semantics=("parallel",)),
        )(x2d, w, b2d)
    else:
        # Pass 1: per-row logsumexp via online accumulation over vocab tiles.
        lse = pl.pallas_call(
            _lse_kernel,
            out_shape=jax.ShapeDtypeStruct((n_pad, 1), jnp.float32),
            grid_spec=pltpu.PrefetchScalarGridSpec(
                num_scalar_prefetch=0,
                grid=(row_tiles, vocab_tiles),
                in_specs=[
                    pl.BlockSpec((tm_eff, d_model), lambda i, j: (i, 0)),
                    pl.BlockSpec((d_model, tn_eff), lambda i, j: (0, j)),
                    pl.BlockSpec((1, tn_eff), lambda i, j: (0, j)),
                ],
                out_specs=pl.BlockSpec((tm_eff, 1), lambda i, j: (i, 0)),
                scratch_shapes=[pltpu.VMEM((tm_eff, 1), jnp.float32)] * 2,
            ),
            compiler_params=compiler(
                dimension_semantics=("parallel", "arbitrary")),
        )(x2d, w, b2d)

        # Pass 2: recompute each logits tile and subtract the row lse.
        out = pl.pallas_call(
            _output_kernel,
            out_shape=jax.ShapeDtypeStruct((n_pad, v_pad), out_dtype),
            grid_spec=pltpu.PrefetchScalarGridSpec(
                num_scalar_prefetch=0,
                grid=(row_tiles, vocab_tiles),
                in_specs=[
                    pl.BlockSpec((tm_eff, d_model), lambda i, j: (i, 0)),
                    pl.BlockSpec((d_model, tn_eff), lambda i, j: (0, j)),
                    pl.BlockSpec((1, tn_eff), lambda i, j: (0, j)),
                    pl.BlockSpec((tm_eff, 1), lambda i, j: (i, 0)),
                ],
                out_specs=pl.BlockSpec((tm_eff, tn_eff), lambda i, j: (i, j)),
            ),
            compiler_params=compiler(
                dimension_semantics=("parallel", "parallel")),
        )(x2d, w, b2d, lse)

    return out[:n, :vocab].reshape(batch, seq, vocab)


# --------------------------------- demo ------------------------------------ #

if __name__ == "__main__":
    key = jax.random.PRNGKey(0)
    kx1, kw1, kb1, kx2, kw2, kb2 = jax.random.split(key, 6)

    def make_params(k_w, k_b, d_model, vocab):
        bound = 1.0 / math.sqrt(d_model)
        w = jax.random.uniform(k_w, (d_model, vocab), jnp.float32, -bound, bound)
        b = jax.random.uniform(k_b, (vocab,), jnp.float32, -bound, bound)
        return w, b

    def reference(x, w, b):
        # Same numerics as the kernel: bf16 matmul inputs, f32 accumulation.
        logits = jnp.einsum(
            "bsd,dv->bsv",
            x.astype(jnp.bfloat16), w.astype(jnp.bfloat16),
            preferred_element_type=jnp.float32) + b
        return jax.nn.log_softmax(logits, axis=-1)

    # 1) Small shapes -> fused (weight-resident) path.
    batch, seq, d_model, vocab = 2, 8, 32, 128
    w, b = make_params(kw1, kb1, d_model, vocab)
    x = jax.random.normal(kx1, (batch, seq, d_model), jnp.float32)
    out = jax.block_until_ready(generator_forward(x, w, b))
    ref = reference(x, w, b)
    assert out.shape == (batch, seq, vocab)
    assert jnp.allclose(out.astype(jnp.float32), ref, atol=2e-3, rtol=2e-3), \
        "fused path mismatch vs reference"

    # 2) Force the vocab-tiled two-pass path (also exercises row/vocab padding).
    batch, seq, d_model, vocab = 3, 5, 32, 200   # rows 15 -> pad 16, vocab -> pad 256
    w, b = make_params(kw2, kb2, d_model, vocab)
    x = jax.random.normal(kx2, (batch, seq, d_model), jnp.float32)
    out = jax.block_until_ready(
        generator_forward(x, w, b, tn=128, force_tiled=True))
    ref = reference(x, w, b)
    assert out.shape == (batch, seq, vocab)
    assert jnp.allclose(out.astype(jnp.float32), ref, atol=2e-3, rtol=2e-3), \
        "tiled path mismatch vs reference"

    print("KERNEL_OK")
</pallas_src>

<mosaic_0001>
module attributes {stable_mosaic.version = 11 : i64} {
  func.func @_fused_kernel(%arg0: i32, %arg1: memref<16x32xbf16, #tpu.memory_space<vmem>>, %arg2: memref<32x128xbf16, #tpu.memory_space<vmem>>, %arg3: memref<1x128xf32, #tpu.memory_space<vmem>>, %arg4: memref<16x128xf32, #tpu.memory_space<vmem>>) attributes {dimension_semantics = [#tpu.dimension_semantics<parallel>], iteration_bounds = array<i64: 1>, scalar_prefetch = 0 : i64, scratch_operands = 0 : i64, tpu.core_type = #tpu.core_type<tc>, window_params = [{transform_indices = @transform_0, window_bounds = array<i64: 16, 32>}, {pipeline_mode = #tpu.pipeline_mode<synchronous>, transform_indices = @transform_1, window_bounds = array<i64: 32, 128>}, {pipeline_mode = #tpu.pipeline_mode<synchronous>, transform_indices = @transform_2, window_bounds = array<i64: 1, 128>}, {transform_indices = @transform_3, window_bounds = array<i64: 16, 128>}]} {
    %c0 = arith.constant 0 : index
    %c0_0 = arith.constant 0 : index
    %0 = vector.load %arg1[%c0, %c0_0] : memref<16x32xbf16, #tpu.memory_space<vmem>>, vector<16x32xbf16>
    %c0_1 = arith.constant 0 : index
    %c0_2 = arith.constant 0 : index
    %1 = vector.load %arg2[%c0_1, %c0_2] : memref<32x128xbf16, #tpu.memory_space<vmem>>, vector<32x128xbf16>
    %cst = arith.constant dense<0.000000e+00> : vector<16x128xf32>
    %2 = tpu.matmul %0, %1, %cst {dimension_numbers = #tpu.dot_dimension_numbers<[1], [0], [0], [1], [0, 0, 1, 1], [], []>} : vector<16x32xbf16>, vector<32x128xbf16>, vector<16x128xf32> -> vector<16x128xf32>
    %c0_3 = arith.constant 0 : index
    %c0_4 = arith.constant 0 : index
    %3 = vector.load %arg3[%c0_3, %c0_4] : memref<1x128xf32, #tpu.memory_space<vmem>>, vector<1x128xf32>
    %4 = vector.broadcast %3 : vector<1x128xf32> to vector<16x128xf32>
    %5 = arith.addf %2, %4 : vector<16x128xf32>
    %cst_5 = arith.constant dense<0xFF800000> : vector<16xf32>
    %6 = vector.multi_reduction <maximumf>, %5, %cst_5 [1] : vector<16x128xf32> to vector<16xf32>
    %7 = vector.shape_cast %6 : vector<16xf32> to vector<16x1xf32>
    %8 = vector.broadcast %7 : vector<16x1xf32> to vector<16x128xf32>
    %9 = arith.subf %5, %8 : vector<16x128xf32>
    %10 = math.exp %9 : vector<16x128xf32>
    %cst_6 = arith.constant dense<0.000000e+00> : vector<16xf32>
    %11 = vector.multi_reduction <add>, %10, %cst_6 [1] : vector<16x128xf32> to vector<16xf32>
    %12 = vector.shape_cast %11 : vector<16xf32> to vector<16x1xf32>
    %13 = math.log %12 : vector<16x1xf32>
    %14 = arith.addf %7, %13 : vector<16x1xf32>
    %15 = vector.broadcast %14 : vector<16x1xf32> to vector<16x128xf32>
    %16 = arith.subf %5, %15 : vector<16x128xf32>
    %c0_7 = arith.constant 0 : index
    %c0_8 = arith.constant 0 : index
    %17 = vector.load %arg4[%c0_7, %c0_8] : memref<16x128xf32, #tpu.memory_space<vmem>>, vector<16x128xf32>
    tpu.vector_store %arg4[%c0_7, %c0_8], %16 {strides = array<i32>} : memref<16x128xf32, #tpu.memory_space<vmem>>, vector<16x128xf32>,
    return
  }
  func.func @transform_0(%arg0: i32) -> (i32, i32) {
    %c0_i32 = arith.constant 0 : i32
    %c0_i32_0 = arith.constant 0 : i32
    return %arg0, %c0_i32 : i32, i32
  }
  func.func @transform_1(%arg0: i32) -> (i32, i32) {
    %c0_i32 = arith.constant 0 : i32
    %c0_i32_0 = arith.constant 0 : i32
    %c0_i32_1 = arith.constant 0 : i32
    return %c0_i32, %c0_i32_0 : i32, i32
  }
  func.func @transform_2(%arg0: i32) -> (i32, i32) {
    %c0_i32 = arith.constant 0 : i32
    %c0_i32_0 = arith.constant 0 : i32
    %c0_i32_1 = arith.constant 0 : i32
    return %c0_i32, %c0_i32_0 : i32, i32
  }
  func.func @transform_3(%arg0: i32) -> (i32, i32) {
    %c0_i32 = arith.constant 0 : i32
    %c0_i32_0 = arith.constant 0 : i32
    return %arg0, %c0_i32 : i32, i32
  }
}

</mosaic_0001>

<bundles_post_ra>
// kernel: tpu_custom_call.1
= control target key start
LH: loop header
LB: loop body
LE: loop exit
PB: predicated region body
PF: predicated region fallthrough
CT: control target
= control target key end

     0   :  { %8 = vsyncpa [#allocation3], 0  ;;  %s337_s0 = inlined_call_operand.hbm [shape: bf16[16,32], index: 0, kind: input, shape index: {}]   ;;  %s338_s1 = inlined_call_operand.hbm [shape: bf16[32,128], index: 1, kind: input, shape index: {}]   ;;  %s339_s2 = inlined_call_operand.vmem [shape: f32[1,128], index: 2, kind: input, shape index: {}]   ;;  %s340_s3 = inlined_call_operand.hbm [shape: f32[16,128], index: 3, kind: output, shape index: {}]  }
   0x1   :  { %9 = vsyncpa [#allocation6], 0 }
   0x2   :  { %10 = vsyncpa [#allocation4], 0  ;;  %s269_s12 = smov [#allocation2]   ;;  %s197_s16 = scalar_lea.hbm %s337_s0, 128 }
   0x3   :  { %s16_s13 = sshll.u32 %s269_s12, 4  ;;  %p198_p0 = scmp.ne.s32.totalorder %s337_s0, %s197_s16  ;;  %s17_s13 = int_to_ptr.vmem [resolvable:$true] %s16_s13 }
   0x4   :  { %p201_p1 = scmp.lt.u32.totalorder %s197_s16, %s337_s0 }
   0x6   :  { %p203_p2 = pnand %p201_p1, %p198_p0 }
   0x8   :  { %206 = shalt.err (!%p203_p2)
}
   0x9   :  { %s207_s21 = scalar_lea.vmem %s17_s13, 128  ;;  %p212_p4 = scmp.lt.s32.totalorder %s17_s13, %s17_s13 }
   0xa   :  { %p208_p3 = scmp.ne.s32.totalorder %s17_s13, %s207_s21  ;;  %p213_p5 = scmp.lt.s32.totalorder %s207_s21, %s207_s21 }
   0xc   :  { %p214_p6 = por %p213_p5, %p212_p4 }
   0xe   :  { %p215_p7 = pnand %p214_p6, %p208_p3 }
  0x10   :  { %218 = shalt.err (!%p215_p7)
}
  0x11   :  { %s270_s22 = smov 64   ;;  %s271_s23 = smov 4  }
  0x12   :  { %22 = dma.hbm_to_vmem [thread:$0]  %s337_s0, 128, %s17_s13, [#allocation3], %s270_s22, %s270_s22, %s271_s23  }
  0x13   :  { %s272_s26 = smov [#allocation5]   ;;  %s219_s30 = scalar_lea.hbm %s338_s1, 256 }
  0x14   :  { %s28_s27 = sshll.u32 %s272_s26, 4  ;;  %p220_p8 = scmp.ne.s32.totalorder %s338_s1, %s219_s30  ;;  %s29_s27 = int_to_ptr.vmem [resolvable:$true] %s28_s27 }
  0x15   :  { %p223_p9 = scmp.lt.u32.totalorder %s219_s30, %s338_s1 }
  0x17   :  { %p225_p10 = pnand %p223_p9, %p220_p8 }
  0x19   :  { %228 = shalt.err (!%p225_p10)
}
  0x1a   :  { %s229_s8 = scalar_lea.vmem %s29_s27, 256  ;;  %p234_p12 = scmp.lt.s32.totalorder %s29_s27, %s29_s27 }
  0x1b   :  { %p230_p11 = scmp.ne.s32.totalorder %s29_s27, %s229_s8  ;;  %p235_p13 = scmp.lt.s32.totalorder %s229_s8, %s229_s8 }
  0x1d   :  { %p236_p0 = por %p235_p13, %p234_p12 }
  0x1f   :  { %p237_p1 = pnand %p236_p0, %p230_p11 }
  0x21   :  { %240 = shalt.err (!%p237_p1)
}
  0x22   :  { %34 = dma.hbm_to_vmem [thread:$0]  %s338_s1, 256, %s29_s27, [#allocation6], %s270_s22, %s270_s22, %s271_s23  }
  0x23   :  { %263 = dma.done.wait [#allocation3], 128  }
  0x24   :  { %264 = vsyncadd [#allocation3], 4294967168 }
  0x25   :  { %265 = dma.done.wait [#allocation6], 256  }
  0x26   :  { %266 = vsyncadd [#allocation6], 4294967040  ;;  %v273_v0 = vmov 0.0   ;;  %vm274_vm0 = vmmov 0   ;;  %v186_v1 = vld [vmem:[#allocation5] sm:$0xff]   ;;  %v187_v2 = vld [vmem:[#allocation5 + $0x8] sm:$0xff]  }
  0x27   :  { %169 = vmatprep.subr.bf16.mxu0 %v273_v0  ;;  %173 = vmatprep.mubr.msk.bf16.mxu0 %vm274_vm0, %v273_v0  ;;  %v188_v3 = vld [vmem:[#allocation2] sm:$0xff]   ;;  %vm74_vm1 = vcmask 261120   ;;  %s275_s1 = smov [#allocation7]  }
  0x28   :  { %170 = vmatpush3.bf16.msra.mxu0 %v186_v1  ;;  %v161_v4 = vld [vmem:[%s339_s2] ss:$0 sm:$0xff]  ;;  %s148_s2 = sshll.u32 %s275_s1, 4  ;;  %s149_s2 = int_to_ptr.vmem [resolvable:$true] %s148_s2 }
  0x29   :  { %171 = vmatprep.subr.bf16.mxu0 %v273_v0  ;;  %s241_s12 = scalar_lea.vmem %s149_s2, 256  ;;  %p246_p3 = scmp.lt.s32.totalorder %s149_s2, %s149_s2 }
  0x2a   :  { %p242_p2 = scmp.ne.s32.totalorder %s149_s2, %s241_s12  ;;  %p247_p4 = scmp.lt.s32.totalorder %s241_s12, %s241_s12 }
  0x2c   :  { %172 = vmatpush3.bf16.msra.mxu0 %v187_v2  ;;  %p248_p5 = por %p247_p4, %p246_p3 }
  0x2e   :  { %p249_p6 = pnand %p248_p5, %p242_p2 }
  0x2f   :  { %174 = vmatmul.mubr.msk.bf16.vlgmr.msra.gmra.mrb[0].mxu0 %vm74_vm1, %v188_v3 }
 0x102   :  { %v112_v5 = vpop.f32.mrb[0].mxu0 }
 0x103   :  { %v113_v6 = vadd.f32 %v161_v4, %v112_v5  ;;  %v175_v7 = vpop.f32.mrb[1].mxu0 }
 0x104   :  { %v115_v8 = vpop.f32.mrb[2].mxu0 }
 0x105   :  { %119 = vmax.xlane.f32.xlu0 %v113_v6  ;;  %v176_v9 = vpop.f32.mrb[3].mxu0  ;;  %v116_v10 = vadd.f32 %v161_v4, %v115_v8 }
 0x109   :  { %121 = vmax.xlane.f32.xlu0 %v116_v10 }
 0x192   :  { %v120_v11 = vpop.xlane.xlu0 %119 }
 0x193   :  { %v123_v12 = vsub.f32 %v113_v6, %v120_v11 }
 0x195   :  { %v125_v13 = vmul.f32 1.442695, %v123_v12 }
 0x196   :  { %v122_v14 = vpop.xlane.xlu0 %121 }
 0x197   :  { %v124_v15 = vsub.f32 %v116_v10, %v122_v14  ;;  %189 = vpow2.f32 %v125_v13 }
 0x199   :  { %v127_v16 = vmul.f32 1.442695, %v124_v15 }
 0x19b   :  { %191 = vpow2.f32 %v127_v16 }
 0x1a1   :  { %v190_v17 = vpop.eup %189 }
 0x1a2   :  { %129 = vadd.xlane.f32.xlu1 %v190_v17 }
 0x1a5   :  { %v192_v18 = vpop.eup %191 }
 0x1a6   :  { %131 = vadd.xlane.f32.xlu1 %v192_v18 }
 0x22f   :  { %v130_v19 = vpop.xlane.xlu1 %129 }
 0x230   :  { %193 = vlog2.f32 %v130_v19 }
 0x233   :  { %v132_v20 = vpop.xlane.xlu1 %131 }
 0x234   :  { %195 = vlog2.f32 %v132_v20 }
 0x23a   :  { %v194_v21 = vpop.eup %193 }
 0x23b   :  { %v134_v22 = vmul.f32 0.6931472, %v194_v21 }
 0x23d   :  { %v137_v23 = vadd.f32 %v134_v22, %v120_v11 }
 0x23e   :  { %v196_v24 = vpop.eup %195 }
 0x23f   :  { %v139_v25 = vsub.f32 %v113_v6, %v137_v23  ;;  %v136_v26 = vmul.f32 0.6931472, %v196_v24 }
 0x241   :  { %141 = vst [vmem:[#allocation7] sm:$0xff] %v139_v25  ;;  %v138_v27 = vadd.f32 %v136_v26, %v122_v14 }
 0x243   :  { %v140_v28 = vsub.f32 %v116_v10, %v138_v27 }
 0x245   :  { %142 = vst [vmem:[#allocation7 + $0x8] sm:$0xff] %v140_v28 }
 0x246   :  { %252 = shalt.err (!%p249_p6)
}
 0x247   :  { %s253_s15 = scalar_lea.hbm %s340_s3, 256 }
 0x248   :  { %p254_p7 = scmp.ne.s32.totalorder %s340_s3, %s253_s15  ;;  %p257_p8 = scmp.lt.u32.totalorder %s253_s15, %s340_s3 }
 0x24a   :  { %p259_p9 = pnand %p257_p8, %p254_p7 }
 0x24c   :  { %262 = shalt.err (!%p259_p9)
}
 0x24d   :  { %s276_s20 = smov 128   ;;  %s277_s21 = smov 8  }
 0x24e   :  { %154 = dma.vmem_to_hbm [thread:$0]  %s149_s2, 256, %s340_s3, [#allocation4], %s276_s20, %s276_s20, %s277_s21  }
 0x24f   :  { %267 = dma.done.wait [#allocation4], 256  }
 0x250   :  { %268 = vsyncadd [#allocation4], 4294967040 }
 0x251   :  { %158 = vsyncpa [#allocation3], 1 }
 0x252   :  { %159 = vsyncpa [#allocation6], 1 }
 0x253   :  { %160 = vsyncpa [#allocation4], 1 }

</bundles_post_ra>
